<compile_context>
chip_gen: v7x
topology: tpu7x:2x2x1
jax: 0.10.0
libtpu: 0.0.40
codegen_flags: <defaults>
</compile_context>

<pallas_src>
import numpy as np

import jax
import jax.numpy as jnp
from jax.experimental import pallas as pl
from jax.experimental.pallas import tpu as pltpu


# ---------------------------------------------------------------------------
# Fused kernel: BN1 -> ReLU -> 1x1 conv (s2 folded) -> +b2 -> ReLU -> 3x3 conv
#   x_ref    : (C_in, H*W)        one image, NCHW flattened (f32)
#   s1/b1    : (C_in, 1)          folded BN1 scale / bias (f32)
#   w1_ref   : (C_mid, C_in)      1x1 conv weight with BN2 scale folded (bf16)
#   b2_ref   : (C_mid, 1)         folded BN2 bias (f32)
#   w2_ref   : (9*C_out, C_mid)   3x3 conv weight, taps stacked row-wise (bf16)
#   mask_ref : (9, 1, H*W)        per-tap boundary-validity masks (f32)
#   o_ref    : (C_out, H*W)       output, NCHW flattened (f32)
# ---------------------------------------------------------------------------
def _make_fused_kernel(H, W, C_out):
    HW = H * W

    def kernel(x_ref, s1_ref, b1_ref, w1_ref, b2_ref, w2_ref, mask_ref, o_ref):
        # ---- BN1 + ReLU (elementwise kept in f32) ---------------------------
        x = x_ref[...].astype(jnp.float32)                      # (C_in, HW)
        h1 = jnp.maximum(x * s1_ref[...] + b1_ref[...], 0.0)

        # ---- 1x1 conv (BN2 scale pre-folded into w1), bf16 MXU, f32 acc -----
        mid = jnp.dot(w1_ref[...], h1.astype(jnp.bfloat16),
                      preferred_element_type=jnp.float32)       # (C_mid, HW)

        # ---- BN2 bias + ReLU -------------------------------------------------
        mid = jnp.maximum(mid + b2_ref[...], 0.0)
        mid_bf = mid.astype(jnp.bfloat16)

        # ---- 3x3 conv: one stacked matmul for all 9 taps ---------------------
        t_all = jnp.dot(w2_ref[...], mid_bf,
                        preferred_element_type=jnp.float32)     # (9*C_out, HW)

        # Center tap (dh=1, dw=1): no shift, always valid.
        acc = t_all[4 * C_out:5 * C_out, :]

        # Remaining 8 taps: lane-roll into place + boundary mask.
        # out[co, h*W + w] += t_tap[co, (h+dh-1)*W + (w+dw-1)]   (if in-bounds)
        for dh in range(3):
            for dw in range(3):
                tap = dh * 3 + dw
                if tap == 4:
                    continue
                shift = (dh - 1) * W + (dw - 1)                  # source offset
                t = t_all[tap * C_out:(tap + 1) * C_out, :]      # aligned rows
                t = pltpu.roll(t, (-shift) % HW, axis=1)         # XLU lane roll
                acc = acc + t * mask_ref[tap]                    # (1, HW) mask

        o_ref[...] = acc.astype(o_ref.dtype)

    return kernel


# ---------------------------------------------------------------------------
# Wrapper
# ---------------------------------------------------------------------------
def dense_layer_forward(x, params):
    """Inference-mode forward of _DenseLayerContainer.

    `x` may be a single NCHW array or a list/tuple of NCHW arrays (which are
    concatenated along channels, matching the module's bn_function).
    """
    if isinstance(x, (list, tuple)):
        x = jnp.concatenate(x, axis=1)

    eps = 1e-5
    N, C_in, H, W = x.shape
    C_mid = params["w1"].shape[0]     # bn_size * growth_rate
    C_out = params["w2"].shape[0]     # growth_rate
    HW = H * W

    # Fold BN params into per-channel scale/bias (inference mode).
    s1 = params["g1"] / jnp.sqrt(params["v1"] + eps)
    b1 = params["b1"] - params["m1"] * s1
    s2 = params["g2"] / jnp.sqrt(params["v2"] + eps)
    b2 = params["b2"] - params["m2"] * s2

    # 1x1 conv weight with BN2 scale folded in: relu(s2*(w1@h) + b2) ==
    # relu((s2[:,None]*w1)@h + b2).  Cast to bf16 for the MXU.
    w1_eff = (params["w1"][:, :, 0, 0] * s2[:, None]).astype(jnp.bfloat16)

    # 3x3 conv weight: (C_out, C_mid, 3, 3) -> (3, 3, C_out, C_mid)
    #   -> stacked taps (9*C_out, C_mid), tap index = dh*3 + dw.
    w2_taps = jnp.transpose(params["w2"], (2, 3, 0, 1)).reshape(9 * C_out, C_mid)
    w2_taps = w2_taps.astype(jnp.bfloat16)

    # Per-tap boundary-validity masks (host-side numpy constants).
    hh, ww = np.meshgrid(np.arange(H), np.arange(W), indexing="ij")
    rows = []
    for dh in range(3):
        for dw in range(3):
            valid = ((hh + dh - 1 >= 0) & (hh + dh - 1 < H) &
                     (ww + dw - 1 >= 0) & (ww + dw - 1 < W))
            rows.append(valid.reshape(-1).astype(np.float32))
    masks = jnp.asarray(np.stack(rows, axis=0).reshape(9, 1, HW))

    # NCHW -> (N, C, H*W): pure reshape, no transpose needed.
    x_flat = x.reshape(N, C_in, HW)

    kernel = _make_fused_kernel(H, W, C_out)

    out = pl.pallas_call(
        kernel,
        out_shape=jax.ShapeDtypeStruct((N, C_out, HW), jnp.float32),
        grid_spec=pltpu.PrefetchScalarGridSpec(
            num_scalar_prefetch=0,
            grid=(N,),
            in_specs=[
                pl.BlockSpec((None, C_in, HW), lambda n: (n, 0, 0)),
                pl.BlockSpec((C_in, 1), lambda n: (0, 0)),
                pl.BlockSpec((C_in, 1), lambda n: (0, 0)),
                pl.BlockSpec((C_mid, C_in), lambda n: (0, 0)),
                pl.BlockSpec((C_mid, 1), lambda n: (0, 0)),
                pl.BlockSpec((9 * C_out, C_mid), lambda n: (0, 0)),
                pl.BlockSpec((9, 1, HW), lambda n: (0, 0, 0)),
            ],
            out_specs=pl.BlockSpec((None, C_out, HW), lambda n: (n, 0, 0)),
        ),
        compiler_params=pltpu.CompilerParams(
            dimension_semantics=("parallel",),
            vmem_limit_bytes=32 * 1024 * 1024,
        ),
    )(x_flat,
      s1.reshape(C_in, 1).astype(jnp.float32),
      b1.reshape(C_in, 1).astype(jnp.float32),
      w1_eff,
      b2.reshape(C_mid, 1).astype(jnp.float32),
      w2_taps,
      masks)

    # (N, C_out, H*W) -> NCHW (pure reshape).
    return out.reshape(N, C_out, H, W)


# ---------------------------------------------------------------------------
# Pure-JAX reference (f32 everywhere) for the correctness check
# ---------------------------------------------------------------------------
def _ref_forward(x_nchw, params):
    eps = 1e-5

    def bn(x, g, b, m, v):
        return ((x - m[None, :, None, None])
                / jnp.sqrt(v[None, :, None, None] + eps)
                * g[None, :, None, None] + b[None, :, None, None])

    h = jax.nn.relu(bn(x_nchw, params["g1"], params["b1"],
                       params["m1"], params["v1"]))
    h = jax.lax.conv_general_dilated(
        h, params["w1"], (1, 1), "VALID",
        dimension_numbers=("NCHW", "OIHW", "NCHW"))
    h = jax.nn.relu(bn(h, params["g2"], params["b2"],
                       params["m2"], params["v2"]))
    out = jax.lax.conv_general_dilated(
        h, params["w2"], (1, 1), ((1, 1), (1, 1)),
        dimension_numbers=("NCHW", "OIHW", "NCHW"))
    return out


if __name__ == "__main__":
    # Module hyper-parameters (small, consistent with the layer definition).
    num_input_features = 4
    growth_rate = 8
    bn_size = 4
    C_mid = bn_size * growth_rate      # 32
    N, H, W = 2, 16, 16

    key = jax.random.PRNGKey(0)
    ks = jax.random.split(key, 11)

    params = {
        # BN1 over num_input_features channels
        "g1": jax.random.uniform(ks[0], (num_input_features,), jnp.float32, 0.5, 1.5),
        "b1": 0.1 * jax.random.normal(ks[1], (num_input_features,), jnp.float32),
        "m1": 0.1 * jax.random.normal(ks[2], (num_input_features,), jnp.float32),
        "v1": jax.random.uniform(ks[3], (num_input_features,), jnp.float32, 0.5, 1.5),
        # conv1: 1x1, num_input_features -> bn_size*growth_rate, no bias
        "w1": 0.2 * jax.random.normal(ks[4], (C_mid, num_input_features, 1, 1), jnp.float32),
        # BN2 over bn_size*growth_rate channels
        "g2": jax.random.uniform(ks[5], (C_mid,), jnp.float32, 0.5, 1.5),
        "b2": 0.1 * jax.random.normal(ks[6], (C_mid,), jnp.float32),
        "m2": 0.1 * jax.random.normal(ks[7], (C_mid,), jnp.float32),
        "v2": jax.random.uniform(ks[8], (C_mid,), jnp.float32, 0.5, 1.5),
        # conv2: 3x3, pad=1, bn_size*growth_rate -> growth_rate, no bias
        "w2": 0.1 * jax.random.normal(ks[9], (growth_rate, C_mid, 3, 3), jnp.float32),
    }

    x = jax.random.normal(ks[10], (N, num_input_features, H, W), jnp.float32)

    out = dense_layer_forward(x, params)
    out = jax.block_until_ready(out)

    ref = jax.block_until_ready(_ref_forward(x, params))
    assert out.shape == (N, growth_rate, H, W), out.shape
    # Tolerance accounts for bf16 MXU operands (f32 accumulation) vs f32 ref.
    max_err = float(jnp.max(jnp.abs(out - ref)))
    assert jnp.allclose(out, ref, atol=5e-2, rtol=5e-2), max_err

    print("KERNEL_OK")
</pallas_src>

<mosaic_0001>
module attributes {stable_mosaic.version = 11 : i64} {
  func.func @kernel(%arg0: i32, %arg1: memref<1x4x256xf32, #tpu.memory_space<vmem>>, %arg2: memref<4x1xf32, #tpu.memory_space<vmem>>, %arg3: memref<4x1xf32, #tpu.memory_space<vmem>>, %arg4: memref<32x4xbf16, #tpu.memory_space<vmem>>, %arg5: memref<32x1xf32, #tpu.memory_space<vmem>>, %arg6: memref<72x32xbf16, #tpu.memory_space<vmem>>, %arg7: memref<9x1x256xf32, #tpu.memory_space<vmem>>, %arg8: memref<1x8x256xf32, #tpu.memory_space<vmem>>) attributes {dimension_semantics = [#tpu.dimension_semantics<parallel>], iteration_bounds = array<i64: 2>, scalar_prefetch = 0 : i64, scratch_operands = 0 : i64, tpu.core_type = #tpu.core_type<tc>, window_params = [{transform_indices = @transform_0, window_bounds = array<i64: 1, 4, 256>}, {pipeline_mode = #tpu.pipeline_mode<synchronous>, transform_indices = @transform_1, window_bounds = array<i64: 4, 1>}, {pipeline_mode = #tpu.pipeline_mode<synchronous>, transform_indices = @transform_2, window_bounds = array<i64: 4, 1>}, {pipeline_mode = #tpu.pipeline_mode<synchronous>, transform_indices = @transform_3, window_bounds = array<i64: 32, 4>}, {pipeline_mode = #tpu.pipeline_mode<synchronous>, transform_indices = @transform_4, window_bounds = array<i64: 32, 1>}, {pipeline_mode = #tpu.pipeline_mode<synchronous>, transform_indices = @transform_5, window_bounds = array<i64: 72, 32>}, {pipeline_mode = #tpu.pipeline_mode<synchronous>, transform_indices = @transform_6, window_bounds = array<i64: 9, 1, 256>}, {transform_indices = @transform_7, window_bounds = array<i64: 1, 8, 256>}]} {
    %c0 = arith.constant 0 : index
    %c0_0 = arith.constant 0 : index
    %c0_1 = arith.constant 0 : index
    %0 = vector.load %arg1[%c0, %c0_0, %c0_1] : memref<1x4x256xf32, #tpu.memory_space<vmem>>, vector<1x4x256xf32>
    %1 = vector.shape_cast %0 : vector<1x4x256xf32> to vector<4x256xf32>
    %c0_2 = arith.constant 0 : index
    %c0_3 = arith.constant 0 : index
    %2 = vector.load %arg2[%c0_2, %c0_3] : memref<4x1xf32, #tpu.memory_space<vmem>>, vector<4x1xf32>
    %3 = vector.broadcast %2 : vector<4x1xf32> to vector<4x256xf32>
    %4 = arith.mulf %1, %3 : vector<4x256xf32>
    %c0_4 = arith.constant 0 : index
    %c0_5 = arith.constant 0 : index
    %5 = vector.load %arg3[%c0_4, %c0_5] : memref<4x1xf32, #tpu.memory_space<vmem>>, vector<4x1xf32>
    %6 = vector.broadcast %5 : vector<4x1xf32> to vector<4x256xf32>
    %7 = arith.addf %4, %6 : vector<4x256xf32>
    %cst = arith.constant 0.000000e+00 : f32
    %8 = vector.broadcast %cst : f32 to vector<4x256xf32>
    %9 = arith.maximumf %7, %8 : vector<4x256xf32>
    %c0_6 = arith.constant 0 : index
    %c0_7 = arith.constant 0 : index
    %10 = vector.load %arg4[%c0_6, %c0_7] : memref<32x4xbf16, #tpu.memory_space<vmem>>, vector<32x4xbf16>
    %11 = arith.truncf %9 : vector<4x256xf32> to vector<4x256xbf16>
    %cst_8 = arith.constant dense<0.000000e+00> : vector<32x256xf32>
    %12 = tpu.matmul %10, %11, %cst_8 {dimension_numbers = #tpu.dot_dimension_numbers<[1], [0], [0], [1], [0, 0, 1, 1], [], []>} : vector<32x4xbf16>, vector<4x256xbf16>, vector<32x256xf32> -> vector<32x256xf32>
    %c0_9 = arith.constant 0 : index
    %c0_10 = arith.constant 0 : index
    %13 = vector.load %arg5[%c0_9, %c0_10] : memref<32x1xf32, #tpu.memory_space<vmem>>, vector<32x1xf32>
    %14 = vector.broadcast %13 : vector<32x1xf32> to vector<32x256xf32>
    %15 = arith.addf %12, %14 : vector<32x256xf32>
    %cst_11 = arith.constant 0.000000e+00 : f32
    %16 = vector.broadcast %cst_11 : f32 to vector<32x256xf32>
    %17 = arith.maximumf %15, %16 : vector<32x256xf32>
    %18 = arith.truncf %17 : vector<32x256xf32> to vector<32x256xbf16>
    %c0_12 = arith.constant 0 : index
    %c0_13 = arith.constant 0 : index
    %19 = vector.load %arg6[%c0_12, %c0_13] : memref<72x32xbf16, #tpu.memory_space<vmem>>, vector<72x32xbf16>
    %cst_14 = arith.constant dense<0.000000e+00> : vector<72x256xf32>
    %20 = tpu.matmul %19, %18, %cst_14 {dimension_numbers = #tpu.dot_dimension_numbers<[1], [0], [0], [1], [0, 0, 1, 1], [], []>} : vector<72x32xbf16>, vector<32x256xbf16>, vector<72x256xf32> -> vector<72x256xf32>
    %21 = vector.extract_strided_slice %20 {offsets = [32, 0], sizes = [8, 256], strides = [1, 1]} : vector<72x256xf32> to vector<8x256xf32>
    %22 = vector.extract_strided_slice %20 {offsets = [0, 0], sizes = [8, 256], strides = [1, 1]} : vector<72x256xf32> to vector<8x256xf32>
    %c17_i32 = arith.constant 17 : i32
    %23 = tpu.dynamic_rotate %22 by %c17_i32 dim 1 : vector<8x256xf32>, i32 -> vector<8x256xf32>
    %c0_15 = arith.constant 0 : index
    %c0_16 = arith.constant 0 : index
    %c0_17 = arith.constant 0 : index
    %24 = vector.load %arg7[%c0_15, %c0_16, %c0_17] : memref<9x1x256xf32, #tpu.memory_space<vmem>>, vector<1x1x256xf32>
    %25 = vector.shape_cast %24 : vector<1x1x256xf32> to vector<1x256xf32>
    %26 = vector.broadcast %25 : vector<1x256xf32> to vector<8x256xf32>
    %27 = arith.mulf %23, %26 : vector<8x256xf32>
    %28 = arith.addf %21, %27 : vector<8x256xf32>
    %29 = vector.extract_strided_slice %20 {offsets = [8, 0], sizes = [8, 256], strides = [1, 1]} : vector<72x256xf32> to vector<8x256xf32>
    %c16_i32 = arith.constant 16 : i32
    %30 = tpu.dynamic_rotate %29 by %c16_i32 dim 1 : vector<8x256xf32>, i32 -> vector<8x256xf32>
    %c1 = arith.constant 1 : index
    %c0_18 = arith.constant 0 : index
    %c0_19 = arith.constant 0 : index
    %31 = vector.load %arg7[%c1, %c0_18, %c0_19] : memref<9x1x256xf32, #tpu.memory_space<vmem>>, vector<1x1x256xf32>
    %32 = vector.shape_cast %31 : vector<1x1x256xf32> to vector<1x256xf32>
    %33 = vector.broadcast %32 : vector<1x256xf32> to vector<8x256xf32>
    %34 = arith.mulf %30, %33 : vector<8x256xf32>
    %35 = arith.addf %28, %34 : vector<8x256xf32>
    %36 = vector.extract_strided_slice %20 {offsets = [16, 0], sizes = [8, 256], strides = [1, 1]} : vector<72x256xf32> to vector<8x256xf32>
    %c15_i32 = arith.constant 15 : i32
    %37 = tpu.dynamic_rotate %36 by %c15_i32 dim 1 : vector<8x256xf32>, i32 -> vector<8x256xf32>
    %c2 = arith.constant 2 : index
    %c0_20 = arith.constant 0 : index
    %c0_21 = arith.constant 0 : index
    %38 = vector.load %arg7[%c2, %c0_20, %c0_21] : memref<9x1x256xf32, #tpu.memory_space<vmem>>, vector<1x1x256xf32>
    %39 = vector.shape_cast %38 : vector<1x1x256xf32> to vector<1x256xf32>
    %40 = vector.broadcast %39 : vector<1x256xf32> to vector<8x256xf32>
    %41 = arith.mulf %37, %40 : vector<8x256xf32>
    %42 = arith.addf %35, %41 : vector<8x256xf32>
    %43 = vector.extract_strided_slice %20 {offsets = [24, 0], sizes = [8, 256], strides = [1, 1]} : vector<72x256xf32> to vector<8x256xf32>
    %c1_i32 = arith.constant 1 : i32
    %44 = tpu.dynamic_rotate %43 by %c1_i32 dim 1 : vector<8x256xf32>, i32 -> vector<8x256xf32>
    %c3 = arith.constant 3 : index
    %c0_22 = arith.constant 0 : index
    %c0_23 = arith.constant 0 : index
    %45 = vector.load %arg7[%c3, %c0_22, %c0_23] : memref<9x1x256xf32, #tpu.memory_space<vmem>>, vector<1x1x256xf32>
    %46 = vector.shape_cast %45 : vector<1x1x256xf32> to vector<1x256xf32>
    %47 = vector.broadcast %46 : vector<1x256xf32> to vector<8x256xf32>
    %48 = arith.mulf %44, %47 : vector<8x256xf32>
    %49 = arith.addf %42, %48 : vector<8x256xf32>
    %50 = vector.extract_strided_slice %20 {offsets = [40, 0], sizes = [8, 256], strides = [1, 1]} : vector<72x256xf32> to vector<8x256xf32>
    %c255_i32 = arith.constant 255 : i32
    %51 = tpu.dynamic_rotate %50 by %c255_i32 dim 1 : vector<8x256xf32>, i32 -> vector<8x256xf32>
    %c5 = arith.constant 5 : index
    %c0_24 = arith.constant 0 : index
    %c0_25 = arith.constant 0 : index
    %52 = vector.load %arg7[%c5, %c0_24, %c0_25] : memref<9x1x256xf32, #tpu.memory_space<vmem>>, vector<1x1x256xf32>
    %53 = vector.shape_cast %52 : vector<1x1x256xf32> to vector<1x256xf32>
    %54 = vector.broadcast %53 : vector<1x256xf32> to vector<8x256xf32>
    %55 = arith.mulf %51, %54 : vector<8x256xf32>
    %56 = arith.addf %49, %55 : vector<8x256xf32>
    %57 = vector.extract_strided_slice %20 {offsets = [48, 0], sizes = [8, 256], strides = [1, 1]} : vector<72x256xf32> to vector<8x256xf32>
    %c241_i32 = arith.constant 241 : i32
    %58 = tpu.dynamic_rotate %57 by %c241_i32 dim 1 : vector<8x256xf32>, i32 -> vector<8x256xf32>
    %c6 = arith.constant 6 : index
    %c0_26 = arith.constant 0 : index
    %c0_27 = arith.constant 0 : index
    %59 = vector.load %arg7[%c6, %c0_26, %c0_27] : memref<9x1x256xf32, #tpu.memory_space<vmem>>, vector<1x1x256xf32>
    %60 = vector.shape_cast %59 : vector<1x1x256xf32> to vector<1x256xf32>
    %61 = vector.broadcast %60 : vector<1x256xf32> to vector<8x256xf32>
    %62 = arith.mulf %58, %61 : vector<8x256xf32>
    %63 = arith.addf %56, %62 : vector<8x256xf32>
    %64 = vector.extract_strided_slice %20 {offsets = [56, 0], sizes = [8, 256], strides = [1, 1]} : vector<72x256xf32> to vector<8x256xf32>
    %c240_i32 = arith.constant 240 : i32
    %65 = tpu.dynamic_rotate %64 by %c240_i32 dim 1 : vector<8x256xf32>, i32 -> vector<8x256xf32>
    %c7 = arith.constant 7 : index
    %c0_28 = arith.constant 0 : index
    %c0_29 = arith.constant 0 : index
    %66 = vector.load %arg7[%c7, %c0_28, %c0_29] : memref<9x1x256xf32, #tpu.memory_space<vmem>>, vector<1x1x256xf32>
    %67 = vector.shape_cast %66 : vector<1x1x256xf32> to vector<1x256xf32>
    %68 = vector.broadcast %67 : vector<1x256xf32> to vector<8x256xf32>
    %69 = arith.mulf %65, %68 : vector<8x256xf32>
    %70 = arith.addf %63, %69 : vector<8x256xf32>
    %71 = vector.extract_strided_slice %20 {offsets = [64, 0], sizes = [8, 256], strides = [1, 1]} : vector<72x256xf32> to vector<8x256xf32>
    %c239_i32 = arith.constant 239 : i32
    %72 = tpu.dynamic_rotate %71 by %c239_i32 dim 1 : vector<8x256xf32>, i32 -> vector<8x256xf32>
    %c8 = arith.constant 8 : index
    %c0_30 = arith.constant 0 : index
    %c0_31 = arith.constant 0 : index
    %73 = vector.load %arg7[%c8, %c0_30, %c0_31] : memref<9x1x256xf32, #tpu.memory_space<vmem>>, vector<1x1x256xf32>
    %74 = vector.shape_cast %73 : vector<1x1x256xf32> to vector<1x256xf32>
    %75 = vector.broadcast %74 : vector<1x256xf32> to vector<8x256xf32>
    %76 = arith.mulf %72, %75 : vector<8x256xf32>
    %77 = arith.addf %70, %76 : vector<8x256xf32>
    %c0_32 = arith.constant 0 : index
    %c0_33 = arith.constant 0 : index
    %c0_34 = arith.constant 0 : index
    %78 = vector.load %arg8[%c0_32, %c0_33, %c0_34] : memref<1x8x256xf32, #tpu.memory_space<vmem>>, vector<1x8x256xf32>
    %79 = vector.shape_cast %78 : vector<1x8x256xf32> to vector<8x256xf32>
    %80 = vector.shape_cast %77 : vector<8x256xf32> to vector<1x8x256xf32>
    tpu.vector_store %arg8[%c0_32, %c0_33, %c0_34], %80 {strides = array<i32>} : memref<1x8x256xf32, #tpu.memory_space<vmem>>, vector<1x8x256xf32>,
    return
  }
  func.func @transform_0(%arg0: i32) -> (i32, i32, i32) {
    %c0_i32 = arith.constant 0 : i32
    %c0_i32_0 = arith.constant 0 : i32
    %c0_i32_1 = arith.constant 0 : i32
    return %arg0, %c0_i32, %c0_i32_0 : i32, i32, i32
  }
  func.func @transform_1(%arg0: i32) -> (i32, i32) {
    %c0_i32 = arith.constant 0 : i32
    %c0_i32_0 = arith.constant 0 : i32
    %c0_i32_1 = arith.constant 0 : i32
    return %c0_i32, %c0_i32_0 : i32, i32
  }
  func.func @transform_2(%arg0: i32) -> (i32, i32) {
    %c0_i32 = arith.constant 0 : i32
    %c0_i32_0 = arith.constant 0 : i32
    %c0_i32_1 = arith.constant 0 : i32
    return %c0_i32, %c0_i32_0 : i32, i32
  }
  func.func @transform_3(%arg0: i32) -> (i32, i32) {
    %c0_i32 = arith.constant 0 : i32
    %c0_i32_0 = arith.constant 0 : i32
    %c0_i32_1 = arith.constant 0 : i32
    return %c0_i32, %c0_i32_0 : i32, i32
  }
  func.func @transform_4(%arg0: i32) -> (i32, i32) {
    %c0_i32 = arith.constant 0 : i32
    %c0_i32_0 = arith.constant 0 : i32
    %c0_i32_1 = arith.constant 0 : i32
    return %c0_i32, %c0_i32_0 : i32, i32
  }
  func.func @transform_5(%arg0: i32) -> (i32, i32) {
    %c0_i32 = arith.constant 0 : i32
    %c0_i32_0 = arith.constant 0 : i32
    %c0_i32_1 = arith.constant 0 : i32
    return %c0_i32, %c0_i32_0 : i32, i32
  }
  func.func @transform_6(%arg0: i32) -> (i32, i32, i32) {
    %c0_i32 = arith.constant 0 : i32
    %c0_i32_0 = arith.constant 0 : i32
    %c0_i32_1 = arith.constant 0 : i32
    %c0_i32_2 = arith.constant 0 : i32
    return %c0_i32, %c0_i32_0, %c0_i32_1 : i32, i32, i32
  }
  func.func @transform_7(%arg0: i32) -> (i32, i32, i32) {
    %c0_i32 = arith.constant 0 : i32
    %c0_i32_0 = arith.constant 0 : i32
    %c0_i32_1 = arith.constant 0 : i32
    return %arg0, %c0_i32, %c0_i32_0 : i32, i32, i32
  }
}

</mosaic_0001>

<bundles_post_ra>
// kernel: tpu_custom_call.1
= control target key start
LH: loop header
LB: loop body
LE: loop exit
PB: predicated region body
PF: predicated region fallthrough
CT: control target
= control target key end

     0   :  { %12 = vsyncpa [#allocation3], 0  ;;  %s1254_s0 = inlined_call_operand.vmem [shape: f32[2,4,256], index: 0, kind: input, shape index: {}]   ;;  %s1255_s1 = inlined_call_operand.vmem [shape: f32[4,1], index: 1, kind: input, shape index: {}]   ;;  %s1256_s2 = inlined_call_operand.vmem [shape: f32[4,1], index: 2, kind: input, shape index: {}]   ;;  %s1257_s3 = inlined_call_operand.vmem [shape: bf16[32,4], index: 3, kind: input, shape index: {}]   ;;  %s1258_s4 = inlined_call_operand.vmem [shape: f32[32,1], index: 4, kind: input, shape index: {}]   ;;  %s1259_s5 = inlined_call_operand.vmem [shape: bf16[72,32], index: 5, kind: input, shape index: {}]   ;;  %s1260_s6 = inlined_call_operand.vmem [shape: f32[9,1,256], index: 6, kind: input, shape index: {}]   ;;  %s1261_s7 = inlined_call_operand.hbm [shape: f32[2,8,256], index: 7, kind: output, shape index: {}]  }
   0x1   :  { %14 = vsyncpa [#allocation3 + $0x1], 0  ;;  %s1041_s24 = smov 0   ;;  %s1043_s25 = smov 0  }
   0x2   :  { %s1045_s26 = smov 0   ;;  %s1047_s27 = smov 0  }
   0x3 LB: > { %s1062_s28 = sadd.s32 4294967295, %s988_s27   ;;  %s828_s29 = sadd.s32 4294967294, %s988_s27   ;;  %s988_s27 = sphi %s1047_s27, %s1267_s27   ;;  %s984_s26 = sphi %s1045_s26, %s1266_s26   ;;  %s980_s25 = sphi %s1043_s25, %s1265_s25   ;;  %s976_s24 = sphi %s1041_s24, %s1264_s24  }
   0x4   : > { %s1066_s30 = sadd.s32 1, %s988_s27   ;;  %s179_s8 = sadd.s32 1, %s984_s26 }
   0x5   : > { %s176_s9 = ssub.s32 %s988_s27, %s1066_s30  ;;  %p189_p0 = scmp.ne.s32.totalorder %s984_s26, %s980_s25 }
   0x6   : > { %p177_p1 = scmp.eq.s32.totalorder %s176_s9, 0  ;;  %p190_p2 = scmp.eq.s32.totalorder %s1062_s28, 1 }
   0x7   : > { %p195_p3 = scmp.ne.s32.totalorder %s980_s25, %s976_s24  ;;  %p196_p4 = scmp.eq.s32.totalorder %s828_s29, 1 }
   0x8   : > { %s1077_s10 = scalar_select %p177_p1, %s984_s26, %s179_s8  }
   0x9   : > { %p1079_p5 = por %p190_p2, %p189_p0  ;;  %p1083_p6 = por %p196_p4, %p195_p3 }
   0xa   : > { %p831_p7 = scmp.ge.s32.totalorder %s988_s27, 1  ;;  %p240_p8 = scmp.lt.s32.totalorder %s988_s27, 3 }
   0xc   : > { %p241_p9 = pnand %p831_p7, %p240_p8 }
   0xd   : > { %v279_v0 = vld [vmem:[%s1255_s1] sm:$0xf] (!%p241_p9)  ;;  %v990_v1 = vmov (!%p241_p9), 0   ;;  %v319_v3 = vld [vmem:[%s1258_s4 + $0x10] sm:$0xff] (!%p241_p9)  ;;  %v318_v5 = vld [vmem:[%s1258_s4 + $0x8] sm:$0xff] (!%p241_p9)  ;;  %p272_p10 = scmp.lt.s32.totalorder (!%p241_p9), %s1062_s28, 1  ;;  %v287_v9 = vlaneseq (!%p241_p9) }
   0xe   : > { %244 = sbr.rel (%p241_p9) target bundleno = 769 (0x301), region = 48  ;;  %917 = vset.pattern.permute.xlu0 (!%p241_p9), %v990_v1  ;;  %397 = vmatprep.mubr.bf16.mxu0 (!%p241_p9), %v990_v1  ;;  %v293_v2 = vld [vmem:[%s1256_s2] sm:$0xf] (!%p241_p9)  ;;  %v320_v6 = vld [vmem:[%s1258_s4 + $0x18] sm:$0xff] (!%p241_p9)  ;;  %v991_v7 = vmov (!%p241_p9), 839922192  }
   0xf   : > { %282 = vperm.xlu0 (!%p241_p9), %917, %v279_v0   ;;  %918 = vset.pattern.permute.xlu1 (!%p241_p9), %v990_v1  ;;  %v317_v4 = vld [vmem:[%s1258_s4] sm:$0xff] (!%p241_p9)  ;;  %v285_v8 = vunpack.c.l.s4 (!%p241_p9), %v991_v7  ;;  %v1114_v11 = vshrl.u32 (!%p241_p9), %v287_v9, 7  ;;  %vm358_vm0 = vcmask (!%p241_p9), 1041408   ;;  %vm351_vm1 = vcmask (!%p241_p9), 31744   ;;  %v920_v26 = vld [vmem:[%s1257_s3 + $0x8] sm:$0xff] (!%p241_p9)   ;;  %v923_v61 = vld [vmem:[%s1259_s5 + $0x10] sm:$0xff] (!%p241_p9)  }
  0x10   : > { %520 = vmatprep.mubr.bf16.mxu1 (!%p241_p9), %v990_v1  ;;  %323 = vperm.xlu1 (!%p241_p9), %918, %v317_v4   ;;  %v919_v25 = vld [vmem:[%s1257_s3] sm:$0xff] (!%p241_p9)   ;;  %v922_v60 = vld [vmem:[%s1259_s5 + $0x8] sm:$0xff] (!%p241_p9)   ;;  %vm462_vm2 = vcmask (!%p241_p9), 261120   ;;  %v924_v62 = vld [vmem:[%s1259_s5 + $0x18] sm:$0xff] (!%p241_p9)   ;;  %s992_s16 = smov (!%p241_p9), 17   ;;  %s993_s17 = smov (!%p241_p9), 15  }
  0x11   : > { %v286_v10 = vunpack.c.0.s8 (!%p241_p9), %v285_v8  ;;  %v921_v59 = vld [vmem:[%s1259_s5] sm:$0xff] (!%p241_p9)   ;;  %s994_s18 = smov (!%p241_p9), 16   ;;  %s995_s19 = smov (!%p241_p9), 1  }
  0x12   : > { %v925_v63 = vld [vmem:[%s1259_s5 + $0x20] ss:$0 sps:$4 sm:$0xff] (!%p241_p9)   ;;  %s996_s20 = smov (!%p241_p9), 127   ;;  %s997_s21 = smov (!%p241_p9), 113  }
  0x13   : > { %296 = vperm.xlu0 (!%p241_p9), %917, %v293_v2   ;;  %v289_v12 = vsub.s32 (!%p241_p9), %v286_v10, %v1114_v11  ;;  %s998_s22 = smov (!%p241_p9), 112   ;;  %s999_s23 = smov (!%p241_p9), 111  }
  0x14   : > { %328 = vperm.xlu1 (!%p241_p9), %918, %v318_v5   ;;  %s269_s29 = sand.u32 (!%p241_p9), 1, %s980_s25   ;;  %s863_s14 = sshll.u32 (!%p241_p9), %s1062_s28, 8 }
  0x15   : > { %s273_s8 = scalar_select %p272_p10, %s1062_s28, 1 }
  0x16   : > { %s832_s13 = sshll.u32 %s269_s29, 4  ;;  %s755_s28 = scalar_lea.sflag [#allocation3], %s269_s29 }
  0x17   : > { %333 = vperm.xlu0 %917, %v319_v3   ;;  %s862_s9 = sshll.u32 %s273_s8, 3 }
  0x18   : > { %338 = vperm.xlu1 %918, %v320_v6   ;;  %s276_s15 = scalar_lea.vmem %s1254_s0, %s862_s9 }
  0x19   : > { %v278_v15 = vld [vmem:[%s276_s15] sm:$0xff]  ;;  %s271_s15 = scalar_lea.vmem [#allocation2], %s832_s13 }
  0x8e   : > { %v283_v13 = vpop.permute.xlu0 %282 }
  0x8f   : > { %v290_v14 = vrot.slane %v283_v13, %v289_v12  ;;  %v324_v27 = vpop.permute.xlu1 %323 }
  0x91   : > { %v292_v17 = vmul.f32 %v290_v14, %v278_v15 }
  0x92   : > { %v297_v16 = vpop.permute.xlu0 %296 }
  0x93   : > { %v304_v18 = vrot.slane %v297_v16, %v289_v12  ;;  %v329_v31 = vpop.permute.xlu1 %328 }
  0x95   : > { %v306_v19 = vadd.f32 %v304_v18, %v292_v17 }
  0x96   : > { %v334_v42 = vpop.permute.xlu0 %333 }
  0x97   : > { %v307_v20 = vmax.f32 %v306_v19, 0.0  ;;  %v339_v47 = vpop.permute.xlu1 %338 }
  0x99   : > { %v313_v21 = vcombine.high %v307_v20, %v307_v20  ;;  %v315_v22 = vpack.c.bf16 %v307_v20, %v307_v20 }
  0x9b   : > { %v316_v23 = vpack.c.bf16 %v313_v21, %v313_v21  ;;  %v360_v24 = vsel %vm358_vm0, %v315_v22, 0  ;;  %v1147_v22 = vand.u32 127, %v287_v9  ;;  %v851_v9 = vld [vmem:[%s1260_s6 + $0x4] sm:$0x3] }
  0x9d   : > { %837 = vmatprep.subr.msk.bf16.mxu0 %vm358_vm0, %v316_v23  ;;  %v1150_v23 = vsub.s32 0, %v1114_v11  ;;  %vm565_vm3 = vcmp.lt.s32.totalorder %v1147_v22, 17  ;;  %vm612_vm4 = vcmp.lt.s32.totalorder %v1147_v22, 15  ;;  %vm588_vm5 = vcmp.lt.s32.totalorder %v1147_v22, 16 }
  0x9e   : > { %366 = vmatpush1.bf16.msra.mxu0 %v360_v24  ;;  %v1153_v24 = vsub.s32 1, %v1114_v11  ;;  %vm636_vm6 = vcmp.lt.s32.totalorder %v1147_v22, 1  ;;  %vm660_vm7 = vcmp.lt.s32.totalorder %v1147_v22, 127  ;;  %vm684_vm8 = vcmp.lt.s32.totalorder %v1147_v22, 113 }
  0x9f   : > { %vm708_vm9 = vcmp.lt.s32.totalorder %v1147_v22, 112  ;;  %vm732_vm10 = vcmp.lt.s32.totalorder %v1147_v22, 111 }
  0xa1   : > { %838 = vmatmul.mubr.msk.bf16.vlgmr.msra.gmra.mrb[0].mxu0 %vm351_vm1, %v919_v25  ;;  %v568_v25 = vld [vmem:[%s1260_s6] sm:$0x3] }
  0xa2   : > { %407 = vmatprep.mubr.bf16.mxu0 %v990_v1 }
  0xa9   : > { %839 = vmatmul.mubr.msk.bf16.gmra.mrb[4].mxu0 %vm351_vm1, %v920_v26  ;;  %v573_v26 = vrot.slane %v568_v25, %v1150_v23 }
  0xaa   : > { %510 = vmatprep.mubr.bf16.mxu0 %v990_v1 }
 0x174   : > { %v399_v28 = vpop.f32.mrb[0].mxu0 }
 0x175   : > { %v400_v29 = vadd.f32 %v399_v28, %v324_v27  ;;  %v401_v30 = vpop.f32.mrb[1].mxu0 }
 0x176   : > { %v402_v32 = vadd.f32 %v401_v30, %v324_v27  ;;  %v403_v33 = vpop.f32.mrb[2].mxu0  ;;  %v577_v27 = vrot.slane %v568_v25, %v1153_v24 }
 0x177   : > { %v404_v34 = vadd.f32 %v403_v33, %v329_v31  ;;  %v405_v35 = vpop.f32.mrb[3].mxu0  ;;  %v418_v37 = vmax.f32 %v400_v29, 0.0  ;;  %v621_v33 = vrot.slane %v851_v9, %v1150_v23 }
 0x178   : > { %v406_v36 = vadd.f32 %v405_v35, %v329_v31  ;;  %v419_v39 = vmax.f32 %v402_v32, 0.0 }
 0x179   : > { %v420_v38 = vmax.f32 %v404_v34, 0.0  ;;  %v625_v34 = vrot.slane %v851_v9, %v1153_v24 }
 0x17a   : > { %v421_v40 = vmax.f32 %v406_v36, 0.0  ;;  %v850_v36 = vld [vmem:[%s1260_s6 + $0x2] sm:$0x3] }
 0x17b   : > { %v426_v41 = vpack.c.bf16 %v420_v38, %v418_v37 }
 0x17c   : > { %v427_v43 = vpack.c.bf16 %v421_v40, %v419_v39  ;;  %v409_v44 = vpop.f32.mrb[4].mxu0 }
 0x17d   : > { %v410_v45 = vadd.f32 %v409_v44, %v334_v42  ;;  %v411_v46 = vpop.f32.mrb[5].mxu0  ;;  %v597_v44 = vrot.slane %v850_v36, %v1150_v23 }
 0x17e   : > { %v412_v48 = vadd.f32 %v411_v46, %v334_v42  ;;  %v413_v49 = vpop.f32.mrb[6].mxu0  ;;  %478 = vmatprep.subr.bf16.mxu0 %v427_v43  ;;  %864 = vmatprep.subr.bf16.mxu1 %v427_v43 }
 0x17f   : > { %v414_v50 = vadd.f32 %v413_v49, %v339_v47  ;;  %v415_v51 = vpop.f32.mrb[7].mxu0  ;;  %479 = vmatpush1.bf16.msra.mxu0 %v426_v41  ;;  %866 = vmatpush1.bf16.msra.mxu1 %v426_v41  ;;  %v422_v53 = vmax.f32 %v410_v45, 0.0  ;;  %v601_v45 = vrot.slane %v850_v36, %v1153_v24 }
 0x180   : > { %v416_v52 = vadd.f32 %v415_v51, %v339_v47  ;;  %v423_v55 = vmax.f32 %v412_v48, 0.0  ;;  %v852_v47 = vld [vmem:[%s1260_s6 + $0x6] sm:$0x3] }
 0x181   : > { %v424_v54 = vmax.f32 %v414_v50, 0.0 }
 0x182   : > { %v425_v56 = vmax.f32 %v416_v52, 0.0 }
 0x183   : > { %v428_v57 = vpack.c.bf16 %v424_v54, %v422_v53  ;;  %v645_v53 = vrot.slane %v852_v47, %v1150_v23  ;;  %v649_v54 = vrot.slane %v852_v47, %v1153_v24 }
 0x184   : > { %v429_v58 = vpack.c.bf16 %v425_v56, %v423_v55  ;;  %v853_v55 = vld [vmem:[%s1260_s6 + $0xa] sm:$0x3] }
 0x186   : > { %480 = vmatprep.subr.bf16.mxu0 %v429_v58  ;;  %865 = vmatprep.subr.bf16.mxu1 %v429_v58 }
 0x187   : > { %481 = vmatpush1.bf16.msra.mxu0 %v428_v57  ;;  %867 = vmatpush1.bf16.msra.mxu1 %v428_v57 }
 0x18a   : > { %845 = vmatmul.mubr.msk.bf16.vlgmr.msra.gmra.mrb[8].mxu0 %vm462_vm2, %v921_v59  ;;  %846 = vmatmul.mubr.msk.bf16.vlgmr.msra.gmra.mrb[0].mxu1 %vm462_vm2, %v922_v60 }
 0x18b   : > { %530 = vmatprep.mubr.bf16.mxu1 %v990_v1 }
 0x192   : > { %847 = vmatmul.mubr.msk.bf16.gmra.mrb[4].mxu1 %vm462_vm2, %v923_v61 }
 0x193   : > { %540 = vmatprep.mubr.bf16.mxu1 %v990_v1 }
 0x19a   : > { %848 = vmatmul.mubr.msk.bf16.gmra.mrb[8].mxu1 %vm462_vm2, %v924_v62  ;;  %v669_v62 = vrot.slane %v853_v55, %v1150_v23 }
 0x19b   : > { %550 = vmatprep.mubr.bf16.mxu1 %v990_v1 }
 0x1a2   : > { %849 = vmatmul.mubr.msk.bf16.gmra.mrb[12].mxu1 %vm462_vm2, %v925_v63  ;;  %v673_v63 = vrot.slane %v853_v55, %v1153_v24 }
 0x25d   : > { %v512_v0 = vpop.f32.mrb[8].mxu0  ;;  %v522_v2 = vpop.f32.mrb[0].mxu1 }
 0x25e   : > { %559 = vrot.lane.b32.xlu0 %v512_v0, %s992_s16  ;;  %v514_v3 = vpop.f32.mrb[9].mxu0  ;;  %v524_v4 = vpop.f32.mrb[1].mxu1 }
 0x25f   : > { %561 = vrot.lane.b32.xlu1 %v514_v3, %s992_s16  ;;  %v516_v5 = vpop.f32.mrb[10].mxu0  ;;  %v526_v6 = vpop.f32.mrb[2].mxu1  ;;  %s769_s16 = sshll.u32 %s271_s15, 4  ;;  %s1212_s16 = int_to_ptr.vmem [resolvable:$true] %s769_s16 }
 0x260   : > { %v518_v7 = vpop.f32.mrb[11].mxu0  ;;  %v528_v8 = vpop.f32.mrb[3].mxu1 }
 0x262   : > { %608 = vrot.lane.b32.xlu0 %v522_v2, %s993_s17 }
 0x263   : > { %610 = vrot.lane.b32.xlu1 %v524_v4, %s993_s17 }
 0x265   : > { %v532_v1 = vpop.f32.mrb[4].mxu1 }
 0x266   : > { %584 = vrot.lane.b32.xlu0 %v516_v5, %s994_s18  ;;  %v534_v10 = vpop.f32.mrb[5].mxu1 }
 0x267   : > { %586 = vrot.lane.b32.xlu1 %v518_v7, %s994_s18  ;;  %v536_v12 = vpop.f32.mrb[6].mxu1 }
 0x268   : > { %v538_v13 = vpop.f32.mrb[7].mxu1 }
 0x26a   : > { %632 = vrot.lane.b32.xlu0 %v526_v6, %s995_s19  ;;  %v854_v6 = vld [vmem:[%s1260_s6 + $0xc] sm:$0x3] }
 0x26b   : > { %634 = vrot.lane.b32.xlu1 %v528_v8, %s995_s19  ;;  %s1210_s19 = scalar_lea.hbm %s1261_s7, %s863_s14 }
 0x26d   : > { %v542_v14 = vpop.f32.mrb[8].mxu1 }
 0x26e   : > { %656 = vrot.lane.b32.xlu0 %v536_v12, %s996_s20  ;;  %v544_v15 = vpop.f32.mrb[9].mxu1 }
 0x26f   : > { %658 = vrot.lane.b32.xlu1 %v538_v13, %s996_s20  ;;  %v546_v16 = vpop.f32.mrb[10].mxu1  ;;  %s926_s20 = scalar_lea.vmem %s1212_s16, 256 }
 0x270   : > { %v548_v17 = vpop.f32.mrb[11].mxu1  ;;  %p927_p11 = scmp.ne.s32.totalorder %s1212_s16, %s926_s20 }
 0x272   : > { %680 = vrot.lane.b32.xlu0 %v542_v14, %s997_s21  ;;  %p928_p12 = pnand %p927_p11, %p1079_p5 }
 0x273   : > { %682 = vrot.lane.b32.xlu1 %v544_v15, %s997_s21  ;;  %v693_v15 = vrot.slane %v854_v6, %v1150_v23  ;;  %s1000_s21 = smov [#allocation2]  }
 0x274   : > { %p929_p13 = pneg %p928_p12 }
 0x275   : > { %v552_v18 = vpop.f32.mrb[12].mxu1 }
 0x276   : > { %704 = vrot.lane.b32.xlu0 %v546_v16, %s998_s22  ;;  %v554_v19 = vpop.f32.mrb[13].mxu1  ;;  %v697_v16 = vrot.slane %v854_v6, %v1153_v24 }
 0x277   : > { %706 = vrot.lane.b32.xlu1 %v548_v17, %s998_s22  ;;  %v556_v20 = vpop.f32.mrb[14].mxu1  ;;  %s930_s22 = sshll.u32 %s1000_s21, 4  ;;  %s931_s22 = int_to_ptr.vmem [resolvable:$false] %s930_s22 }
 0x278   : > { %v557_v21 = vpop.f32.mrb[15].mxu1  ;;  %p933_p0 = scmp.lt.s32.totalorder %s1212_s16, %s931_s22 }
 0x27a   : > { %728 = vrot.lane.b32.xlu0 %v552_v18, %s999_s23  ;;  %v855_v18 = vld [vmem:[%s1260_s6 + $0xe] sm:$0x3] }
 0x27b   : > { %730 = vrot.lane.b32.xlu1 %v554_v19, %s999_s23  ;;  %v717_v9 = vrot.slane %v855_v18, %v1150_v23  ;;  %s932_s23 = scalar_lea.vmem %s931_s22, 512 }
 0x27c   : > { %p934_p1 = scmp.lt.s32.totalorder %s932_s23, %s926_s20 }
 0x27e   : > { %p935_p2 = por %p934_p1, %p933_p0 }
 0x280   : > { %p936_p3 = pnand %p935_p2, %p929_p13 }
 0x2d0   : > { %v560_v28 = vpop.permute.xlu0 %559 }
 0x2d1   : > { %v562_v29 = vpop.permute.xlu1 %561 }
 0x2d2   : > { %v566_v30 = vsel %vm565_vm3, %v560_v28, %v562_v29  ;;  %v567_v31 = vsel %vm565_vm3, %v562_v29, %v560_v28  ;;  %v721_v29 = vrot.slane %v855_v18, %v1153_v24 }
 0x2d3   : > { %v580_v11 = vmul.f32 %v573_v26, %v567_v31  ;;  %v581_v32 = vmul.f32 %v577_v27, %v566_v30  ;;  %v856_v31 = vld [vmem:[%s1260_s6 + $0x10] sm:$0x3] }
 0x2d4   : > { %v609_v35 = vpop.permute.xlu0 %608 }
 0x2d5   : > { %v582_v37 = vadd.f32 %v580_v11, %v532_v1  ;;  %v583_v38 = vadd.f32 %v581_v32, %v534_v10  ;;  %v611_v39 = vpop.permute.xlu1 %610 }
 0x2d6   : > { %v613_v40 = vsel %vm612_vm4, %v609_v35, %v611_v39  ;;  %v614_v41 = vsel %vm612_vm4, %v611_v39, %v609_v35  ;;  %v745_v39 = vrot.slane %v856_v31, %v1153_v24 }
 0x2d7   : > { %v628_v42 = vmul.f32 %v621_v33, %v614_v41  ;;  %v629_v43 = vmul.f32 %v625_v34, %v613_v40 }
 0x2d8   : > { %v585_v46 = vpop.permute.xlu0 %584 }
 0x2d9   : > { %v587_v48 = vpop.permute.xlu1 %586 }
 0x2da   : > { %v589_v49 = vsel %vm588_vm5, %v585_v46, %v587_v48  ;;  %v590_v50 = vsel %vm588_vm5, %v587_v48, %v585_v46 }
 0x2db   : > { %v604_v51 = vmul.f32 %v597_v44, %v590_v50  ;;  %v605_v52 = vmul.f32 %v601_v45, %v589_v49 }
 0x2dc   : > { %v633_v56 = vpop.permute.xlu0 %632 }
 0x2dd   : > { %v606_v57 = vadd.f32 %v604_v51, %v582_v37  ;;  %v607_v58 = vadd.f32 %v605_v52, %v583_v38  ;;  %v635_v59 = vpop.permute.xlu1 %634  ;;  %v741_v38 = vrot.slane %v856_v31, %v1150_v23 }
 0x2de   : > { %v637_v60 = vsel %vm636_vm6, %v633_v56, %v635_v59  ;;  %v638_v61 = vsel %vm636_vm6, %v635_v59, %v633_v56 }
 0x2df   : > { %v630_v0 = vadd.f32 %v628_v42, %v606_v57  ;;  %v631_v2 = vadd.f32 %v629_v43, %v607_v58  ;;  %v652_v3 = vmul.f32 %v645_v53, %v638_v61  ;;  %v653_v4 = vmul.f32 %v649_v54, %v637_v60 }
 0x2e0   : > { %v657_v5 = vpop.permute.xlu0 %656 }
 0x2e1   : > { %v654_v7 = vadd.f32 %v652_v3, %v630_v0  ;;  %v655_v8 = vadd.f32 %v653_v4, %v631_v2  ;;  %v659_v1 = vpop.permute.xlu1 %658 }
 0x2e2   : > { %v661_v10 = vsel %vm660_vm7, %v657_v5, %v659_v1  ;;  %v662_v12 = vsel %vm660_vm7, %v659_v1, %v657_v5 }
 0x2e3   : > { %v676_v13 = vmul.f32 %v669_v62, %v661_v10  ;;  %v677_v14 = vmul.f32 %v673_v63, %v662_v12 }
 0x2e4   : > { %v681_v17 = vpop.permute.xlu0 %680 }
 0x2e5   : > { %v678_v19 = vadd.f32 %v676_v13, %v654_v7  ;;  %v679_v20 = vadd.f32 %v677_v14, %v655_v8  ;;  %v683_v21 = vpop.permute.xlu1 %682 }
 0x2e6   : > { %v685_v25 = vsel %vm684_vm8, %v681_v17, %v683_v21  ;;  %v686_v26 = vsel %vm684_vm8, %v683_v21, %v681_v17 }
 0x2e7   : > { %v700_v27 = vmul.f32 %v693_v15, %v685_v25  ;;  %v701_v28 = vmul.f32 %v697_v16, %v686_v26 }
 0x2e8   : > { %v705_v30 = vpop.permute.xlu0 %704 }
 0x2e9   : > { %v702_v11 = vadd.f32 %v700_v27, %v678_v19  ;;  %v703_v32 = vadd.f32 %v701_v28, %v679_v20  ;;  %v707_v33 = vpop.permute.xlu1 %706 }
 0x2ea   : > { %v709_v34 = vsel %vm708_vm9, %v705_v30, %v707_v33  ;;  %v710_v35 = vsel %vm708_vm9, %v707_v33, %v705_v30 }
 0x2eb   : > { %v724_v36 = vmul.f32 %v717_v9, %v709_v34  ;;  %v725_v37 = vmul.f32 %v721_v29, %v710_v35 }
 0x2ec   : > { %v729_v40 = vpop.permute.xlu0 %728 }
 0x2ed   : > { %v726_v41 = vadd.f32 %v724_v36, %v702_v11  ;;  %v727_v42 = vadd.f32 %v725_v37, %v703_v32  ;;  %v731_v43 = vpop.permute.xlu1 %730 }
 0x2ee   : > { %v733_v44 = vsel %vm732_vm10, %v729_v40, %v731_v43  ;;  %v734_v45 = vsel %vm732_vm10, %v731_v43, %v729_v40 }
 0x2ef   : > { %v748_v46 = vmul.f32 %v741_v38, %v733_v44  ;;  %v749_v47 = vmul.f32 %v745_v39, %v734_v45 }
 0x2f1   : > { %v750_v22 = vadd.f32 %v748_v46, %v726_v41  ;;  %v751_v48 = vadd.f32 %v749_v47, %v727_v42 }
 0x2f3   : > { %752 = vst [vmem:[%s271_s15] sm:$0xff] %v750_v22  ;;  %753 = vst [vmem:[%s271_s15 + $0x8] sm:$0xff] %v751_v48 }
 0x2f4   : > { %939 = shalt.err (!%p936_p3)
}
 0x2f5   : > { %s940_s29 = scalar_lea.hbm %s1210_s19, 256  ;;  %s944_s13 = scalar_lea.hbm %s1261_s7, 512 }
 0x2f6   : > { %p941_p4 = scmp.ne.s32.totalorder %s1210_s19, %s940_s29  ;;  %p945_p9 = scmp.lt.u32.totalorder %s1210_s19, %s1261_s7 }
 0x2f7   : > { %p946_p10 = scmp.lt.u32.totalorder %s944_s13, %s940_s29  ;;  %p948_p12 = scmp.lt.u32.totalorder %s940_s29, %s1210_s19 }
 0x2f8   : > { %p942_p7 = pnand %p941_p4, %p1079_p5 }
 0x2f9   : > { %p947_p11 = por %p946_p10, %p945_p9 }
 0x2fa   : > { %p943_p8 = pneg %p942_p7 }
 0x2fb   : > { %p949_p13 = por %p948_p12, %p947_p11 }
 0x2fd   : > { %p950_p0 = pnand %p949_p13, %p943_p8 }
 0x2ff   : > { %953 = shalt.err (!%p950_p0)
}
 0x300   : > { %868 = dma.vmem_to_hbm [thread:$0]  (%p1079_p5), %s1212_s16, 256, %s1210_s19, %s755_s28  }
 0x301 PF: > { %p874_p1 = scmp.ge.s32.totalorder %s988_s27, 2  ;;  %s781_s17 = sand.u32 1, %s976_s24  }
 0x302   : > { %s782_s18 = scalar_lea.sflag [#allocation3], %s781_s17 }
 0x303   : > { %p871_p2 = pnand %p874_p1, %p1083_p6 }
 0x305   : > { %971 = dma.done.wait (!%p871_p2), %s782_s18, 256  }
 0x306   : > { %973 = vsyncadd (!%p871_p2), %s782_s18, 4294967040  ;;  %p17_p3 = scmp.ge.s32.totalorder %s1066_s30, 4   ;;  %s1264_s24 = smov %s980_s25 }
 0x307   : > { %s1265_s25 = smov %s984_s26  ;;  %s1266_s26 = smov %s1077_s10 }
 0x308   : > { %s1267_s27 = smov %s1066_s30  ;;  %19 = sbr.rel (!%p17_p3) target bundleno = 3 (0x3), region = 90 }
 0x30f   :  { %787 = vsyncpa [#allocation3], 1 }
 0x310   :  { %789 = vsyncpa [#allocation3 + $0x1], 1 }

</bundles_post_ra>
